<compile_context>
chip_gen: v5e
topology: v5e:2x2
jax: 0.10.0
libtpu: 0.0.40
codegen_flags: <defaults>
</compile_context>

<pallas_src>
import functools

import jax
import jax.numpy as jnp
from jax import lax
from jax.experimental import pallas as pl
from jax.experimental.pallas import tpu as pltpu


def _round_up(x: int, m: int) -> int:
    return ((x + m - 1) // m) * m


# ---------------------------------------------------------------------------
# Path A: embedding table resident in VMEM; gather a (T, D) chunk per step.
# ---------------------------------------------------------------------------
def _resident_gather_kernel(idx_ref, tab_ref, out_ref, *, tokens_per_step):
    # idx_ref: SMEM (Npad,) int32 scalar-prefetch token indices.
    # tab_ref: VMEM (V, D) resident table (constant index_map -> DMA'd once).
    # out_ref: VMEM (T, D) output chunk for grid step i.
    base = pl.program_id(0) * tokens_per_step

    def body(t, carry):
        row = idx_ref[base + t]
        out_ref[pl.ds(t, 1), :] = tab_ref[pl.ds(row, 1), :]
        return carry

    lax.fori_loop(0, tokens_per_step, body, 0)


# ---------------------------------------------------------------------------
# Path B: table stays in HBM; K outstanding row DMAs straight into out_ref.
# ---------------------------------------------------------------------------
def _hbm_gather_kernel(idx_ref, tab_hbm_ref, out_ref, sem,
                       *, tokens_per_step, dma_slots):
    # idx_ref:     SMEM (Npad,) int32 scalar-prefetch token indices.
    # tab_hbm_ref: HBM (V, D) embedding table (memory_space=pl.ANY, no auto DMA).
    # out_ref:     VMEM (T, D) output chunk -- DMA destination (no vector ops).
    # sem:         DMA semaphores, one per in-flight copy slot.
    base = pl.program_id(0) * tokens_per_step
    T = tokens_per_step
    K = dma_slots

    def copy_desc(t):
        row = idx_ref[base + t]
        return pltpu.make_async_copy(
            tab_hbm_ref.at[pl.ds(row, 1), :],
            out_ref.at[pl.ds(t, 1), :],
            sem.at[t % K],
        )

    def issue_body(t, carry):
        # Keep at most K copies in flight: before reusing slot t % K, wait for
        # copy t-K (same slot, same transfer size).
        @pl.when(t >= K)
        def _():
            copy_desc(t - K).wait()

        copy_desc(t).start()
        return carry

    lax.fori_loop(0, T, issue_body, 0)

    # Drain the last min(K, T) outstanding copies before the pipeline writes
    # this output block back to HBM.
    def drain_body(t, carry):
        copy_desc(t).wait()
        return carry

    lax.fori_loop(max(T - K, 0), T, drain_body, 0)


# ---------------------------------------------------------------------------
# Wrapper (nn.Embedding.forward equivalent).
# ---------------------------------------------------------------------------
def embeddings_layer_forward(
    src,
    weight,
    *,
    max_tokens_per_step: int = 256,       # chunk size T (multiple of 8)
    dma_slots: int = 8,                    # outstanding row DMAs (path B)
    resident_table_bytes_max: int = 16 * 1024 * 1024,  # v7x-safe threshold
):
    """src: int array of any shape; weight: [V, D] -> src.shape + (D,)."""
    orig_shape = tuple(src.shape)
    V, D = weight.shape
    N = 1
    for s in orig_shape:
        N *= int(s)
    itemsize = jnp.dtype(weight.dtype).itemsize

    # Clamp defensively (PyTorch raises on OOB; we document the divergence).
    idx = jnp.clip(src.reshape(N).astype(jnp.int32), 0, V - 1)

    # Chunk size: multiple of 8 sublanes, no bigger than needed.
    T = max(8, min(_round_up(max_tokens_per_step, 8), _round_up(N, 8)))
    n_chunks = pl.cdiv(N, T)
    n_pad = n_chunks * T
    if n_pad != N:
        idx = jnp.pad(idx, (0, n_pad - N))  # pads with valid index 0

    table_bytes = V * D * itemsize
    out_chunk_bytes = T * D * itemsize
    resident = table_bytes <= resident_table_bytes_max

    # Memory-bound cost hint for XLA's scheduler.
    cost = pl.CostEstimate(
        flops=0,
        transcendentals=0,
        bytes_accessed=int(N * D * itemsize
                           + min(V * D, N * D) * itemsize
                           + N * 4),
    )

    # Conservative VMEM budget (assume double-buffering everywhere); only
    # raise the scoped-VMEM limit when actually needed, capped well under
    # v7x's 64 MiB physical VMEM.
    vmem_needed = (2 * table_bytes if resident else 0) \
        + 2 * out_chunk_bytes + (1 << 20)
    vmem_limit = None
    if vmem_needed > 16 * 1024 * 1024:
        vmem_limit = int(min(vmem_needed + (4 << 20), 56 * 1024 * 1024))

    out_spec = pl.BlockSpec((T, D), lambda i, idx_ref: (i, 0))
    out_shape = jax.ShapeDtypeStruct((n_pad, D), weight.dtype)

    if resident:
        grid_spec = pltpu.PrefetchScalarGridSpec(
            num_scalar_prefetch=1,
            grid=(n_chunks,),
            in_specs=[
                # Full-array block, constant index_map -> table DMA'd to VMEM
                # once and kept resident across all chunks.
                pl.BlockSpec((V, D), lambda i, idx_ref: (0, 0)),
            ],
            out_specs=out_spec,
        )
        kernel = functools.partial(_resident_gather_kernel, tokens_per_step=T)
    else:
        k_slots = max(1, min(dma_slots, T))
        grid_spec = pltpu.PrefetchScalarGridSpec(
            num_scalar_prefetch=1,
            grid=(n_chunks,),
            in_specs=[
                # Table stays in HBM; rows are gathered with manual DMAs.
                pl.BlockSpec(memory_space=pl.ANY),
            ],
            out_specs=out_spec,
            scratch_shapes=[pltpu.SemaphoreType.DMA((k_slots,))],
        )
        kernel = functools.partial(
            _hbm_gather_kernel, tokens_per_step=T, dma_slots=k_slots)

    out_flat = pl.pallas_call(
        kernel,
        out_shape=out_shape,
        grid_spec=grid_spec,
        compiler_params=pltpu.CompilerParams(
            # Chunk axis is independent -> sharded across the 2 TCs on v7x.
            dimension_semantics=("parallel",),
            vmem_limit_bytes=vmem_limit,
        ),
        cost_estimate=cost,
    )(idx, weight)

    # NOTE: for the demo D=32 (<128 lanes) the output slab is lane-sparse;
    # real embedding dims (>=128) make every (T, D) store/writeback dense.
    return out_flat[:N].reshape(orig_shape + (D,))


if __name__ == "__main__":
    key = jax.random.PRNGKey(0)
    k_w, k_idx = jax.random.split(key)

    # Small shapes consistent with the demo: vocab=64, embedding_dim=32,
    # batch=2, seq=8.
    input_dim, embedding_dim = 64, 32
    B, S = 2, 8

    # nn.Embedding default init ~ N(0, 1); deterministic synthetic weights.
    weight = jax.random.normal(k_w, (input_dim, embedding_dim), dtype=jnp.float32)
    src = jax.random.randint(k_idx, (B, S), 0, input_dim, dtype=jnp.int32)

    ref = jnp.take(weight, src, axis=0)  # plain-JAX reference gather

    # Path A: resident-table fast path (default for this small table).
    out_a = embeddings_layer_forward(src, weight)
    out_a = jax.block_until_ready(out_a)
    assert out_a.shape == (B, S, embedding_dim), out_a.shape
    assert out_a.dtype == weight.dtype
    assert jnp.array_equal(out_a, ref), "resident-table path mismatch"

    # Path B: HBM-gather path with manual multi-slot DMAs (forced by setting
    # the residency threshold to 0) -- exercises the large-table code path.
    out_b = embeddings_layer_forward(src, weight, resident_table_bytes_max=0)
    out_b = jax.block_until_ready(out_b)
    assert jnp.array_equal(out_b, ref), "HBM-gather path mismatch"

    print("KERNEL_OK")
</pallas_src>

<mosaic_0001>
module attributes {stable_mosaic.version = 11 : i64} {
  func.func @_resident_gather_kernel(%arg0: i32, %arg1: memref<16xi32, #tpu.memory_space<smem>>, %arg2: memref<64x32xf32, #tpu.memory_space<vmem>>, %arg3: memref<16x32xf32, #tpu.memory_space<vmem>>) attributes {dimension_semantics = [#tpu.dimension_semantics<parallel>], iteration_bounds = array<i64: 1>, scalar_prefetch = 1 : i64, scratch_operands = 0 : i64, tpu.core_type = #tpu.core_type<tc>, window_params = [{pipeline_mode = #tpu.pipeline_mode<synchronous>, transform_indices = @transform_0, window_bounds = array<i64: 64, 32>}, {transform_indices = @transform_1, window_bounds = array<i64: 16, 32>}]} {
    %c16_i32 = arith.constant 16 : i32
    %0 = arith.muli %arg0, %c16_i32 : i32
    %c0_i32 = arith.constant 0 : i32
    %c16_i32_0 = arith.constant 16 : i32
    %1 = arith.addi %c0_i32, %c16_i32_0 : i32
    %c1_i32 = arith.constant 1 : i32
    scf.for %arg4 = %c0_i32 to %1 step %c1_i32  : i32 {
      %2 = arith.addi %0, %arg4 : i32
      %3 = arith.index_cast %2 : i32 to index
      %4 = memref.load %arg1[%3] : memref<16xi32, #tpu.memory_space<smem>>
      %5 = arith.index_cast %4 : i32 to index
      %c0 = arith.constant 0 : index
      %6 = vector.load %arg2[%5, %c0] : memref<64x32xf32, #tpu.memory_space<vmem>>, vector<1x32xf32>
      %7 = arith.index_cast %arg4 : i32 to index
      %c0_2 = arith.constant 0 : index
      %8 = vector.load %arg3[%7, %c0_2] : memref<16x32xf32, #tpu.memory_space<vmem>>, vector<1x32xf32>
      tpu.vector_store %arg3[%7, %c0_2], %6 {strides = array<i32>} : memref<16x32xf32, #tpu.memory_space<vmem>>, vector<1x32xf32>,
    }
    %c16_i32_1 = arith.constant 16 : i32
    return
  }
  func.func @transform_0(%arg0: i32, %arg1: memref<16xi32, #tpu.memory_space<smem>>) -> (i32, i32) {
    %c0_i32 = arith.constant 0 : i32
    %c0_i32_0 = arith.constant 0 : i32
    %c0_i32_1 = arith.constant 0 : i32
    return %c0_i32, %c0_i32_0 : i32, i32
  }
  func.func @transform_1(%arg0: i32, %arg1: memref<16xi32, #tpu.memory_space<smem>>) -> (i32, i32) {
    %c0_i32 = arith.constant 0 : i32
    %c0_i32_0 = arith.constant 0 : i32
    return %arg0, %c0_i32 : i32, i32
  }
}

</mosaic_0001>

<bundles_post_ra>
// kernel: tpu_custom_call.1
= control target key start
LH: loop header
LB: loop body
LE: loop exit
PB: predicated region body
PF: predicated region fallthrough
CT: control target
= control target key end

     0   :  { %s117_s12 = smov [#allocation3]   ;;  %s145_s0 = inlined_call_operand.vmem [shape: s32[16], index: 0, kind: input, shape index: {}]   ;;  %s146_s1 = inlined_call_operand.vmem [shape: f32[64,32], index: 1, kind: input, shape index: {}]   ;;  %s147_s2 = inlined_call_operand.hbm [shape: f32[16,32], index: 2, kind: output, shape index: {}]  }
   0x1   :  { %s8_s11 = sshll.u32 %s145_s0, 4  ;;  %s9_s11 = int_to_ptr.vmem [resolvable:$true] %s8_s11 }
   0x2   :  { %11 = dma.vmem_to_smem %s9_s11, 16, %s117_s12, [#allocation2] }
   0x3   :  { %109 = dma.done.wait [#allocation2], 16 }
   0x4   :  { %110 = vsyncadd [#allocation2], 4294967280 }
   0x5   :  { %14 = sfence }
   0x6   :  { %15 = vsyncpa [#allocation5], 0  ;;  %s113_s13 = smov 0  }
   0x7 LB: > { %s26_s14 = sld [smem:[#allocation3 + %s115_s13]]  ;;  %vm30_vm0 = vcmask 253952   ;;  %s29_s18 = scalar_lea.vmem [#allocation4], %s115_s13  ;;  %s115_s13 = sphi %s113_s13, %s24_s13  }
   0x8   : > { %s24_s13 = sadd.s32 1, %s115_s13  }
   0x9   : > { %p21_p0 = scmp.ge.s32.totalorder %s24_s13, 16  }
   0xa   :  { %s38_s20 = sshll.u32 (%p21_p0), %s147_s2, 4  ;;  %s118_s21 = smov (%p21_p0), [#allocation4]   ;;  %s39_s20 = int_to_ptr.hbm [resolvable:$true] %s38_s20 }
   0xb   :  { %23 = sbr.rel (!%p21_p0) target bundleno = 7 (0x7), region = 33  ;;  %s36_s22 = sshll.u32 (%p21_p0), %s118_s21, 4  ;;  %s37_s22 = int_to_ptr.vmem [resolvable:$true] %s36_s22 }
   0xc   :  { %s119_s23 = smov (%p21_p0), 128   ;;  %s120_s24 = smov (%p21_p0), 8  }
   0xd   : > { %s27_s17 = scalar_lea.vmem %s146_s1, %s26_s14 }
   0xe   : > { %v28_v0 = vld [vmem:[%s27_s17] sm:$0x1] }
   0xf   : > { %31 = vst.msk [vmem:[%s29_s18] sm:$0x1] %vm30_vm0, %v28_v0 }
  0x10   :  { %44 = dma.vmem_to_hbm [thread:$0]  %s37_s22, 256, %s39_s20, [#allocation5], %s119_s23, %s119_s23, %s120_s24  }
  0x11   :  { %111 = dma.done.wait [#allocation5], 256  }
  0x12   :  { %112 = vsyncadd [#allocation5], 4294967040 }
  0x13   :  { %49 = vsyncpa [#allocation5], 1 }

</bundles_post_ra>
